<compile_context>
chip_gen: v7x
topology: tpu7x:2x2x1
jax: 0.10.0
libtpu: 0.0.40
codegen_flags: <defaults>
</compile_context>

<pallas_src>
import jax
import jax.numpy as jnp
from jax.experimental import pallas as pl
from jax.experimental.pallas import tpu as pltpu

LANE = 128


def _round_up(n, m):
    return ((n + m - 1) // m) * m


def _vmem_capacity_bytes():
    """Per-core VMEM capacity; conservative fallback (v7x = 64 MiB/TensorCore)."""
    try:
        info = pltpu.get_tpu_info()
        cap = getattr(info, "vmem_capacity_bytes", None)
        if cap:
            return int(cap)
    except Exception:
        pass
    return 64 << 20


def _vae_encoder_kernel(x_ref, m_ref, w_ref, b_ref, o_ref):
    # x_ref: (TB, S, D)  token embeddings, native dtype
    # m_ref: (TB, S, 1)  attention mask already scaled by 1/clamp(count, 1e-9), f32
    # w_ref: (D, Lp)     linear weight (transposed vs torch [L, D]), lane-padded
    # b_ref: (1, Lp)     bias, lane-padded
    # o_ref: (TB, Lp)    output
    x = x_ref[...].astype(jnp.float32)                   # f32 accumulation (ref parity)
    pooled = jnp.sum(x * m_ref[...], axis=1)             # (TB, D) masked mean
    y = jnp.dot(pooled, w_ref[...], preferred_element_type=jnp.float32) + b_ref[...]
    o_ref[...] = jnp.tanh(y).astype(o_ref.dtype)


def vae_encoder_forward(token_embeddings, weight_t, bias, attention_mask=None,
                        *, target_block_bytes=12 << 20):
    """token_embeddings: [B, S, D] (any float dtype); weight_t: [D, L]; bias: [L];
    attention_mask: [B, S] or None."""
    B, S, D = token_embeddings.shape
    L = weight_t.shape[1]
    Lp = _round_up(L, LANE)

    x_itemsize = jnp.dtype(token_embeddings.dtype).itemsize
    # Padded dims as they will actually sit in VMEM.
    Dp = _round_up(D, LANE)                       # lane padding of x's minor dim
    sub_x = 8 * max(1, 4 // x_itemsize)           # sublane tile: 8 f32 / 16 bf16 / 32 i8
    Sp_x = _round_up(S, sub_x)
    Sp_f32 = _round_up(S, 8)

    if attention_mask is None:
        attention_mask = jnp.ones((B, S), dtype=jnp.float32)
    mask_f32 = attention_mask.astype(jnp.float32)

    # Hoisted out of the kernel: fold the 1/count normalization into the mask.
    counts = jnp.maximum(jnp.sum(mask_f32, axis=1, keepdims=True), 1e-9)
    mask_scaled = (mask_f32 / counts)[:, :, None]                         # (B, S, 1) f32

    # Lane-pad the small output dim so the (TB, Lp) store is lane-dense.
    w_pad = jnp.zeros((D, Lp), jnp.float32).at[:, :L].set(weight_t.astype(jnp.float32))
    b_pad = jnp.zeros((1, Lp), jnp.float32).at[:, :L].set(
        bias.astype(jnp.float32).reshape(1, L))

    # ---- VMEM budgeting: padded block sizes, 2x double buffering, device-aware cap.
    vmem_budget = (_vmem_capacity_bytes() * 3) // 4      # leave ~25% headroom

    def working_set_bytes(tb):
        x_blk = tb * Sp_x * Dp * x_itemsize              # x tile (lane/sublane padded)
        m_blk = tb * Sp_f32 * LANE * 4                   # (tb, S, 1) pads to 128 lanes
        o_blk = _round_up(tb, 8) * Lp * 4                # output tile
        w_blk = _round_up(D, 8) * Lp * 4                 # resident weight
        b_blk = 8 * Lp * 4                               # resident bias
        return 2 * (x_blk + m_blk + o_blk) + 2 * (w_blk + b_blk)

    row_bytes = Sp_x * Dp * x_itemsize + Sp_f32 * LANE * 4   # padded bytes per batch row
    tb = max(1, int(target_block_bytes) // max(1, row_bytes))
    if tb < B:
        tb = max(8, (tb // 8) * 8)    # keep the (tb, Lp) output block sublane-aligned
    tb = min(tb, B)
    # Megacore: if one step would cover the whole batch but B can be split into two
    # sublane-aligned tiles, halve the tile so v7x's 2 TensorCores both get work.
    if tb == B and B >= 16:
        tb = min(B, _round_up((B + 1) // 2, 8))
    # Hard VMEM check with padded + double-buffered sizes; shrink until it fits.
    while working_set_bytes(tb) > vmem_budget and tb > 8:
        tb = max(8, ((tb - 1) // 8) * 8)
    tb = min(tb, B)
    # TODO(synk): for configs where even a tb<=8 slab exceeds the VMEM budget, add an
    # S-axis ("arbitrary", last) grid split with a VMEM f32 accumulator.

    grid = (pl.cdiv(B, tb),)
    vmem_limit = int(min(vmem_budget,
                         max(16 << 20, 2 * working_set_bytes(tb))))

    cost = pl.CostEstimate(
        flops=2 * B * S * D + 2 * B * D * Lp,
        transcendentals=B * Lp,
        bytes_accessed=(B * S * D * x_itemsize       # x
                        + B * S * 4                  # mask
                        + D * Lp * 4 + Lp * 4        # weight, bias
                        + B * Lp * 4))               # out

    out = pl.pallas_call(
        _vae_encoder_kernel,
        out_shape=jax.ShapeDtypeStruct((B, Lp), jnp.float32),
        grid=grid,
        in_specs=[
            pl.BlockSpec((tb, S, D), lambda b: (b, 0, 0)),   # x, native dtype, pipelined
            pl.BlockSpec((tb, S, 1), lambda b: (b, 0, 0)),   # mask * 1/count
            pl.BlockSpec((D, Lp),    lambda b: (0, 0)),      # weight (resident)
            pl.BlockSpec((1, Lp),    lambda b: (0, 0)),      # bias   (resident)
        ],
        out_specs=pl.BlockSpec((tb, Lp), lambda b: (b, 0)),
        compiler_params=pltpu.CompilerParams(
            dimension_semantics=("parallel",),
            vmem_limit_bytes=vmem_limit),
        cost_estimate=cost,
    )(token_embeddings, mask_scaled, w_pad, b_pad)

    return out[:, :L]


def reference_forward(token_embeddings, weight_t, bias, attention_mask):
    m_exp = attention_mask[:, :, None].astype(jnp.float32)
    x = token_embeddings.astype(jnp.float32)
    pooled = jnp.sum(x * m_exp, axis=1) / jnp.maximum(jnp.sum(m_exp, axis=1), 1e-9)
    return jnp.tanh(pooled @ weight_t.astype(jnp.float32) + bias.astype(jnp.float32))


if __name__ == "__main__":
    # config: d_input = 32, latent_size = 16; batch = 2, seq = 8
    B, S, D, L = 2, 8, 32, 16

    key = jax.random.PRNGKey(0)
    k_x, k_m, k_w, k_b = jax.random.split(key, 4)

    token_embeddings = jax.random.normal(k_x, (B, S, D), dtype=jnp.float32)
    # deterministic mask with some padding positions zeroed
    attention_mask = (jax.random.uniform(k_m, (B, S)) > 0.3).astype(jnp.float32)
    # synthetic nn.Linear(d_input, latent_size) params; weight stored transposed [D, L]
    weight_t = jax.random.normal(k_w, (D, L), dtype=jnp.float32) * 0.1
    bias = jax.random.normal(k_b, (L,), dtype=jnp.float32) * 0.1

    out = vae_encoder_forward(token_embeddings, weight_t, bias, attention_mask)
    out = jax.block_until_ready(out)

    ref = reference_forward(token_embeddings, weight_t, bias, attention_mask)
    assert out.shape == (B, L)
    assert jnp.allclose(out, ref, atol=1e-5, rtol=1e-5), "mismatch vs reference"

    print("KERNEL_OK")
</pallas_src>

<mosaic_0001>
module attributes {stable_mosaic.version = 11 : i64} {
  func.func @_vae_encoder_kernel(%arg0: i32, %arg1: memref<2x8x32xf32, #tpu.memory_space<vmem>>, %arg2: memref<2x8x1xf32, #tpu.memory_space<vmem>>, %arg3: memref<32x128xf32, #tpu.memory_space<vmem>>, %arg4: memref<1x128xf32, #tpu.memory_space<vmem>>, %arg5: memref<2x128xf32, #tpu.memory_space<vmem>>) attributes {dimension_semantics = [#tpu.dimension_semantics<parallel>], iteration_bounds = array<i64: 1>, scalar_prefetch = 0 : i64, scratch_operands = 0 : i64, tpu.core_type = #tpu.core_type<tc>, window_params = [{transform_indices = @transform_0, window_bounds = array<i64: 2, 8, 32>}, {transform_indices = @transform_1, window_bounds = array<i64: 2, 8, 1>}, {pipeline_mode = #tpu.pipeline_mode<synchronous>, transform_indices = @transform_2, window_bounds = array<i64: 32, 128>}, {pipeline_mode = #tpu.pipeline_mode<synchronous>, transform_indices = @transform_3, window_bounds = array<i64: 1, 128>}, {transform_indices = @transform_4, window_bounds = array<i64: 2, 128>}]} {
    %c0 = arith.constant 0 : index
    %c0_0 = arith.constant 0 : index
    %c0_1 = arith.constant 0 : index
    %0 = vector.load %arg1[%c0, %c0_0, %c0_1] : memref<2x8x32xf32, #tpu.memory_space<vmem>>, vector<2x8x32xf32>
    %c0_2 = arith.constant 0 : index
    %c0_3 = arith.constant 0 : index
    %c0_4 = arith.constant 0 : index
    %1 = vector.load %arg2[%c0_2, %c0_3, %c0_4] : memref<2x8x1xf32, #tpu.memory_space<vmem>>, vector<2x8x1xf32>
    %2 = vector.broadcast %1 : vector<2x8x1xf32> to vector<2x8x32xf32>
    %3 = arith.mulf %0, %2 : vector<2x8x32xf32>
    %cst = arith.constant dense<0.000000e+00> : vector<2x32xf32>
    %4 = vector.multi_reduction <add>, %3, %cst [1] : vector<2x8x32xf32> to vector<2x32xf32>
    %c0_5 = arith.constant 0 : index
    %c0_6 = arith.constant 0 : index
    %5 = vector.load %arg3[%c0_5, %c0_6] : memref<32x128xf32, #tpu.memory_space<vmem>>, vector<32x128xf32>
    %cst_7 = arith.constant dense<0.000000e+00> : vector<2x128xf32>
    %6 = tpu.matmul %4, %5, %cst_7 {dimension_numbers = #tpu.dot_dimension_numbers<[1], [0], [0], [1], [0, 0, 1, 1], [], []>} : vector<2x32xf32>, vector<32x128xf32>, vector<2x128xf32> -> vector<2x128xf32>
    %c0_8 = arith.constant 0 : index
    %c0_9 = arith.constant 0 : index
    %7 = vector.load %arg4[%c0_8, %c0_9] : memref<1x128xf32, #tpu.memory_space<vmem>>, vector<1x128xf32>
    %8 = vector.broadcast %7 : vector<1x128xf32> to vector<2x128xf32>
    %9 = arith.addf %6, %8 : vector<2x128xf32>
    %10 = math.tanh %9 : vector<2x128xf32>
    %c0_10 = arith.constant 0 : index
    %c0_11 = arith.constant 0 : index
    %11 = vector.load %arg5[%c0_10, %c0_11] : memref<2x128xf32, #tpu.memory_space<vmem>>, vector<2x128xf32>
    tpu.vector_store %arg5[%c0_10, %c0_11], %10 {strides = array<i32>} : memref<2x128xf32, #tpu.memory_space<vmem>>, vector<2x128xf32>,
    return
  }
  func.func @transform_0(%arg0: i32) -> (i32, i32, i32) {
    %c0_i32 = arith.constant 0 : i32
    %c0_i32_0 = arith.constant 0 : i32
    %c0_i32_1 = arith.constant 0 : i32
    return %arg0, %c0_i32, %c0_i32_0 : i32, i32, i32
  }
  func.func @transform_1(%arg0: i32) -> (i32, i32, i32) {
    %c0_i32 = arith.constant 0 : i32
    %c0_i32_0 = arith.constant 0 : i32
    %c0_i32_1 = arith.constant 0 : i32
    return %arg0, %c0_i32, %c0_i32_0 : i32, i32, i32
  }
  func.func @transform_2(%arg0: i32) -> (i32, i32) {
    %c0_i32 = arith.constant 0 : i32
    %c0_i32_0 = arith.constant 0 : i32
    %c0_i32_1 = arith.constant 0 : i32
    return %c0_i32, %c0_i32_0 : i32, i32
  }
  func.func @transform_3(%arg0: i32) -> (i32, i32) {
    %c0_i32 = arith.constant 0 : i32
    %c0_i32_0 = arith.constant 0 : i32
    %c0_i32_1 = arith.constant 0 : i32
    return %c0_i32, %c0_i32_0 : i32, i32
  }
  func.func @transform_4(%arg0: i32) -> (i32, i32) {
    %c0_i32 = arith.constant 0 : i32
    %c0_i32_0 = arith.constant 0 : i32
    return %arg0, %c0_i32 : i32, i32
  }
}

</mosaic_0001>

<bundles_post_ra>
// kernel: tpu_custom_call.1
= control target key start
LH: loop header
LB: loop body
LE: loop exit
PB: predicated region body
PF: predicated region fallthrough
CT: control target
= control target key end

     0   :  { %9 = vsyncpa [#allocation3], 0  ;;  %s325_s0 = inlined_call_operand.vmem [shape: f32[2,8,32], index: 0, kind: input, shape index: {}]   ;;  %s326_s1 = inlined_call_operand.vmem [shape: f32[2,8,1], index: 1, kind: input, shape index: {}]   ;;  %s327_s2 = inlined_call_operand.hbm [shape: f32[32,128], index: 2, kind: input, shape index: {}]   ;;  %s328_s3 = inlined_call_operand.vmem [shape: f32[1,128], index: 3, kind: input, shape index: {}]   ;;  %s329_s4 = inlined_call_operand.hbm [shape: f32[2,128], index: 4, kind: output, shape index: {}]  }
   0x1   :  { %10 = vsyncpa [#allocation4], 0  ;;  %s250_s15 = smov [#allocation2]   ;;  %s202_s19 = scalar_lea.hbm %s327_s2, 512 }
   0x2   :  { %s20_s16 = sshll.u32 %s250_s15, 4  ;;  %p203_p0 = scmp.ne.s32.totalorder %s327_s2, %s202_s19  ;;  %s21_s16 = int_to_ptr.vmem [resolvable:$true] %s20_s16 }
   0x3   :  { %p206_p1 = scmp.lt.u32.totalorder %s202_s19, %s327_s2 }
   0x5   :  { %p208_p2 = pnand %p206_p1, %p203_p0 }
   0x7   :  { %211 = shalt.err (!%p208_p2)
}
   0x8   :  { %s212_s24 = scalar_lea.vmem %s21_s16, 512  ;;  %p217_p4 = scmp.lt.s32.totalorder %s21_s16, %s21_s16 }
   0x9   :  { %p213_p3 = scmp.ne.s32.totalorder %s21_s16, %s212_s24  ;;  %p218_p5 = scmp.lt.s32.totalorder %s212_s24, %s212_s24 }
   0xb   :  { %p219_p6 = por %p218_p5, %p217_p4 }
   0xd   :  { %p220_p7 = pnand %p219_p6, %p213_p3 }
   0xf   :  { %223 = shalt.err (!%p220_p7)
}
  0x10   :  { %s251_s25 = smov 128   ;;  %s252_s26 = smov 8  }
  0x11   :  { %26 = dma.hbm_to_vmem [thread:$0]  %s327_s2, 512, %s21_s16, [#allocation3], %s251_s25, %s251_s25, %s252_s26  }
  0x12   :  { %246 = dma.done.wait [#allocation3], 512  }
  0x13   :  { %247 = vsyncadd [#allocation3], 4294966784  ;;  %v253_v0 = vmov 0   ;;  %v34_v1 = vld [vmem:[%s326_s1] sm:$0xff]  ;;  %v35_v2 = vld [vmem:[%s326_s1 + $0x8] sm:$0xff]  ;;  %v254_v6 = vmov 0.0|0.0  }
  0x14   :  { %199 = vset.pattern.permute.xlu0 %v253_v0  ;;  %v63_v3 = vld [vmem:[#allocation2] sm:$0xff]  ;;  %v64_v4 = vld [vmem:[#allocation2 + $0x8] sm:$0xff]  ;;  %185 = vmatprep.subr.bf16.mxu0 %v254_v6  ;;  %v65_v7 = vld [vmem:[#allocation2 + $0x10] sm:$0xff]  ;;  %vm255_vm0 = vmmov 0   ;;  %v256_v10 = vmov 0.0   ;;  %vm48_vm1 = vcmask 261120  }
  0x15   :  { %38 = vperm.xlu0 %199, %v34_v1   ;;  %v186_v5 = vpack.c.bf16 %v64_v4, %v63_v3  ;;  %v66_v8 = vld [vmem:[#allocation2 + $0x18] sm:$0xff]  ;;  %182 = vmatprep.mubr.msk.f32.mxu0 %vm255_vm0, %v256_v10  ;;  %v32_v11 = vld [vmem:[%s325_s0] sm:$0xff]  ;;  %v33_v14 = vld [vmem:[%s325_s0 + $0x8] sm:$0xff]  ;;  %vm76_vm2 = vcmask 1041409   ;;  %s257_s10 = smov [#allocation5]  }
  0x16   :  { %v189_v9 = vpack.c.bf16 %v66_v8, %v65_v7  ;;  %v167_v32 = vld [vmem:[%s328_s3] ss:$0 sm:$0xff]  ;;  %s158_s11 = sshll.u32 %s257_s10, 4  ;;  %s159_s11 = int_to_ptr.vmem [resolvable:$true] %s158_s11 }
  0x17   :  { %187 = vmatpush3.bf16.msra.mxu0 %v186_v5  ;;  %s224_s12 = scalar_lea.vmem %s159_s11, 32  ;;  %p229_p9 = scmp.lt.s32.totalorder %s159_s11, %s159_s11 }
  0x18   :  { %188 = vmatprep.subr.bf16.mxu0 %v254_v6  ;;  %p225_p8 = scmp.ne.s32.totalorder %s159_s11, %s224_s12  ;;  %p230_p10 = scmp.lt.s32.totalorder %s224_s12, %s224_s12 }
  0x19   :  { %43 = vperm.xlu0 %199, %v35_v2  }
  0x1a   :  { %p231_p11 = por %p230_p10, %p229_p9 }
  0x1b   :  { %190 = vmatpush3.bf16.msra.mxu0 %v189_v9 }
  0x1c   :  { %p232_p12 = pnand %p231_p11, %p225_p8 }
  0x94   :  { %v39_v12 = vpop.permute.xlu0 %38 }
  0x95   :  { %v46_v13 = vmul.f32 %v39_v12, %v32_v11 }
  0x97   :  { %v49_v15 = vsel %vm48_vm1, %v46_v13, 0.0 }
  0x98   :  { %v50_v16 = vrot.slane %v49_v15, 4  ;;  %v44_v17 = vpop.permute.xlu0 %43 }
  0x99   :  { %v47_v18 = vmul.f32 %v44_v17, %v33_v14 }
  0x9a   :  { %v51_v19 = vadd.f32 %v50_v16, %v49_v15 }
  0x9b   :  { %v56_v20 = vsel %vm48_vm1, %v47_v18, 0.0 }
  0x9c   :  { %v52_v21 = vrot.slane %v51_v19, 2  ;;  %v57_v22 = vrot.slane %v56_v20, 4 }
  0x9e   :  { %v53_v23 = vadd.f32 %v52_v21, %v51_v19  ;;  %v58_v24 = vadd.f32 %v57_v22, %v56_v20 }
  0xa0   :  { %v59_v25 = vrot.slane %v58_v24, 2  ;;  %v54_v26 = vrot.slane %v53_v23, 1 }
  0xa2   :  { %v60_v27 = vadd.f32 %v59_v25, %v58_v24  ;;  %v55_v29 = vadd.f32 %v54_v26, %v53_v23 }
  0xa4   :  { %v61_v28 = vrot.slane %v60_v27, 1 }
  0xa6   :  { %v62_v30 = vadd.f32 %v61_v28, %v60_v27 }
  0xa8   :  { %v77_v31 = vsel %vm76_vm2, %v62_v30, %v55_v29 }
  0xa9   :  { %183 = vmatmul.mubr.msk.f32.vlgmr.msra.gmra.mrb[0].mxu0 %vm48_vm1, %v77_v31 }
 0x17c   :  { %v146_v33 = vpop.f32.mrb[0].mxu0 }
 0x17d   :  { %v147_v34 = vadd.f32 %v167_v32, %v146_v33  ;;  %v184_v35 = vpop.f32.mrb[1].mxu0 }
 0x17f   :  { %200 = vtanh.f32 %v147_v34 }
 0x189   :  { %v201_v36 = vpop.eup %200 }
 0x18a   :  { %151 = vst [vmem:[#allocation5] sm:$0x3] %v201_v36 }
 0x18b   :  { %235 = shalt.err (!%p232_p12)
}
 0x18c   :  { %s236_s3 = scalar_lea.hbm %s329_s4, 32 }
 0x18d   :  { %p237_p13 = scmp.ne.s32.totalorder %s329_s4, %s236_s3  ;;  %p240_p0 = scmp.lt.u32.totalorder %s236_s3, %s329_s4 }
 0x18f   :  { %p242_p1 = pnand %p240_p0, %p237_p13 }
 0x191   :  { %245 = shalt.err (!%p242_p1)
}
 0x192   :  { %161 = dma.vmem_to_hbm [thread:$0]  %s159_s11, 32, %s329_s4, [#allocation4]  }
 0x193   :  { %248 = dma.done.wait [#allocation4], 32  }
 0x194   :  { %249 = vsyncadd [#allocation4], 4294967264 }
 0x195   :  { %165 = vsyncpa [#allocation3], 1 }
 0x196   :  { %166 = vsyncpa [#allocation4], 1 }

</bundles_post_ra>
